<compile_context>
chip_gen: v6e
topology: v6e:2x2x1
jax: 0.10.0
libtpu: 0.0.40
codegen_flags: <defaults>
</compile_context>

<pallas_src>
import jax
import jax.numpy as jnp
from jax.experimental import pallas as pl
from jax.experimental.pallas import tpu as pltpu

_LANE_COLS = 1024      # lane-dense last dim (multiple of 128)
_BLOCK_ROWS = 1024     # 1024 x 1024 x 4B = 4 MiB per f32 block (16 MiB double-buffered)


def _trapezoid_clamp_kernel(params_ref, x_ref, y_ref):
    """Fast path, valid only when a < b and c < d (selected in the wrapper)."""
    # params_ref (SMEM, f32): [a, b, c, d, inv_ba, inv_dc]
    a = params_ref[0]
    d = params_ref[3]
    inv_ba = params_ref[4]           # 1/(b-a), precomputed
    inv_dc = params_ref[5]           # 1/(d-c), precomputed

    x = x_ref[...].astype(jnp.float32)
    up = (x - a) * inv_ba            # rising edge
    dn = (d - x) * inv_dc            # falling edge
    y = jnp.maximum(jnp.minimum(jnp.minimum(up, dn), 1.0), 0.0)
    y_ref[...] = y.astype(y_ref.dtype)


def _trapezoid_select_kernel(params_ref, x_ref, y_ref):
    """General path (handles degenerate a==b / b==c / c==d), ordered selects."""
    a = params_ref[0]
    b = params_ref[1]
    c = params_ref[2]
    d = params_ref[3]
    inv_ba = params_ref[4]           # 1/(b-a) if a < b else 0 (gated in wrapper)
    inv_dc = params_ref[5]           # 1/(d-c) if c < d else 0

    x = x_ref[...].astype(jnp.float32)
    y = jnp.zeros_like(x)
    # The scalar gates from the PyTorch `if`s are implied by the element-wise
    # conditions (a < x <= b can only hold when a < b, etc.), so they are omitted.
    y = jnp.where((a < x) & (x <= b), (x - a) * inv_ba, y)
    y = jnp.where((b < x) & (x < c), jnp.float32(1.0), y)
    # Applied last -> overrides, exactly like the ordered in-place writes.
    y = jnp.where((c <= x) & (x < d), (d - x) * inv_dc, y)
    y_ref[...] = y.astype(y_ref.dtype)


def trapezoidal_membfunc(x, a, b, c, d):
    """Apply the trapezoidal membership function elementwise via Pallas."""
    orig_shape = x.shape
    dtype = x.dtype
    n = int(x.size)

    a_f, b_f, c_f, d_f = float(a), float(b), float(c), float(d)
    # Scalar reciprocals, gated so degenerate a==b / c==d never produce inf/NaN.
    inv_ba = 1.0 / (b_f - a_f) if a_f < b_f else 0.0
    inv_dc = 1.0 / (d_f - c_f) if c_f < d_f else 0.0
    params = jnp.array([a_f, b_f, c_f, d_f, inv_ba, inv_dc], dtype=jnp.float32)

    # Clamp form only when both slopes are real; otherwise the exact ordered-select path.
    kernel = _trapezoid_clamp_kernel if (a_f < b_f and c_f < d_f) else _trapezoid_select_kernel

    cols = _LANE_COLS
    x_flat = x.reshape(-1)                      # contiguous reshape: free
    rows = pl.cdiv(n, cols)
    n_pad = rows * cols
    padded = n_pad != n
    if padded:
        # Only when n is not a multiple of the lane width (one extra HBM pass).
        x_flat = jnp.pad(x_flat, (0, n_pad - n))
    x2d = x_flat.reshape(rows, cols)

    if rows <= 8:
        # Truly tiny input: one full-extent block (bypasses the (8,128) rule).
        block_rows = int(rows)
    else:
        # At least 2 blocks (shards across v7x's two TensorCores, overlaps DMA with
        # compute), at most _BLOCK_ROWS rows per block, sublane-aligned (multiple of 8).
        # The ragged last block is masked by Pallas: OOB writes are dropped and the
        # garbage reads feed dead lanes (no reductions in this kernel).
        half = -(-rows // 2)
        block_rows = min(_BLOCK_ROWS, ((half + 7) // 8) * 8)
    grid = (pl.cdiv(rows, block_rows),)

    y2d = pl.pallas_call(
        kernel,
        out_shape=jax.ShapeDtypeStruct((rows, cols), dtype),
        grid_spec=pltpu.PrefetchScalarGridSpec(
            num_scalar_prefetch=1,
            grid=grid,
            in_specs=[pl.BlockSpec((block_rows, cols), lambda i, p: (i, 0))],
            out_specs=pl.BlockSpec((block_rows, cols), lambda i, p: (i, 0)),
        ),
        compiler_params=pltpu.CompilerParams(
            dimension_semantics=("parallel",),
            # 16 MiB double-buffered footprint at the largest block; raise the scoped
            # limit explicitly (v5e default is 16 MiB) while staying well inside
            # v7x's 64 MiB physical VMEM.
            vmem_limit_bytes=40 * 1024 * 1024,
        ),
    )(params, x2d)

    if padded:
        return y2d.reshape(-1)[:n].reshape(orig_shape)
    return y2d.reshape(orig_shape)


def _reference(x, a, b, c, d):
    """Plain-JAX reference mirroring the PyTorch forward (for verification)."""
    xf = x.astype(jnp.float32)
    y = jnp.zeros_like(xf)
    if a < b:
        y = jnp.where((a < xf) & (xf <= b), (xf - a) / (b - a), y)
    if b < c:
        y = jnp.where((b < xf) & (xf < c), 1.0, y)
    if c < d:
        y = jnp.where((c <= xf) & (xf < d), (d - xf) / (d - c), y)
    return y.astype(x.dtype)


if __name__ == "__main__":
    key = jax.random.PRNGKey(0)
    x = jax.random.uniform(key, (2, 4, 16, 16), dtype=jnp.float32,
                           minval=0.0, maxval=3.5)

    # Non-degenerate trapezoid (clamp-form kernel).
    a, b, c, d = 0.5, 1.0, 2.0, 3.0
    y = jax.block_until_ready(trapezoidal_membfunc(x, a, b, c, d))
    y_ref = _reference(x, a, b, c, d)
    assert y.shape == x.shape and y.dtype == x.dtype
    assert jnp.allclose(y, y_ref, atol=1e-6), "mismatch vs reference (trapezoid)"

    # Degenerate rectangle (a==b, c==d) exercises the ordered-select kernel.
    ra, rb, rc, rd = 1.0, 1.0, 2.5, 2.5
    yr = jax.block_until_ready(trapezoidal_membfunc(x, ra, rb, rc, rd))
    yr_ref = _reference(x, ra, rb, rc, rd)
    assert jnp.allclose(yr, yr_ref, atol=1e-6), "mismatch vs reference (rectangle)"

    print("KERNEL_OK")
</pallas_src>

<mosaic_0001>
module attributes {stable_mosaic.version = 11 : i64} {
  func.func @_trapezoid_clamp_kernel(%arg0: i32, %arg1: memref<6xf32, #tpu.memory_space<smem>>, %arg2: memref<2x1024xf32, #tpu.memory_space<vmem>>, %arg3: memref<2x1024xf32, #tpu.memory_space<vmem>>) attributes {dimension_semantics = [#tpu.dimension_semantics<parallel>], iteration_bounds = array<i64: 1>, scalar_prefetch = 1 : i64, scratch_operands = 0 : i64, tpu.core_type = #tpu.core_type<tc>, window_params = [{transform_indices = @transform_0, window_bounds = array<i64: 2, 1024>}, {transform_indices = @transform_1, window_bounds = array<i64: 2, 1024>}]} {
    %c0 = arith.constant 0 : index
    %0 = memref.load %arg1[%c0] : memref<6xf32, #tpu.memory_space<smem>>
    %c3 = arith.constant 3 : index
    %1 = memref.load %arg1[%c3] : memref<6xf32, #tpu.memory_space<smem>>
    %c4 = arith.constant 4 : index
    %2 = memref.load %arg1[%c4] : memref<6xf32, #tpu.memory_space<smem>>
    %c5 = arith.constant 5 : index
    %3 = memref.load %arg1[%c5] : memref<6xf32, #tpu.memory_space<smem>>
    %c0_0 = arith.constant 0 : index
    %c0_1 = arith.constant 0 : index
    %4 = vector.load %arg2[%c0_0, %c0_1] : memref<2x1024xf32, #tpu.memory_space<vmem>>, vector<2x1024xf32>
    %5 = vector.broadcast %0 : f32 to vector<2x1024xf32>
    %6 = arith.subf %4, %5 : vector<2x1024xf32>
    %7 = vector.broadcast %2 : f32 to vector<2x1024xf32>
    %8 = arith.mulf %6, %7 : vector<2x1024xf32>
    %9 = vector.broadcast %1 : f32 to vector<2x1024xf32>
    %10 = arith.subf %9, %4 : vector<2x1024xf32>
    %11 = vector.broadcast %3 : f32 to vector<2x1024xf32>
    %12 = arith.mulf %10, %11 : vector<2x1024xf32>
    %13 = arith.minimumf %8, %12 : vector<2x1024xf32>
    %cst = arith.constant 1.000000e+00 : f32
    %14 = vector.broadcast %cst : f32 to vector<2x1024xf32>
    %15 = arith.minimumf %13, %14 : vector<2x1024xf32>
    %cst_2 = arith.constant 0.000000e+00 : f32
    %16 = vector.broadcast %cst_2 : f32 to vector<2x1024xf32>
    %17 = arith.maximumf %15, %16 : vector<2x1024xf32>
    %c0_3 = arith.constant 0 : index
    %c0_4 = arith.constant 0 : index
    %18 = vector.load %arg3[%c0_3, %c0_4] : memref<2x1024xf32, #tpu.memory_space<vmem>>, vector<2x1024xf32>
    tpu.vector_store %arg3[%c0_3, %c0_4], %17 {strides = array<i32>} : memref<2x1024xf32, #tpu.memory_space<vmem>>, vector<2x1024xf32>,
    return
  }
  func.func @transform_0(%arg0: i32, %arg1: memref<6xf32, #tpu.memory_space<smem>>) -> (i32, i32) {
    %c0_i32 = arith.constant 0 : i32
    %c0_i32_0 = arith.constant 0 : i32
    return %arg0, %c0_i32 : i32, i32
  }
  func.func @transform_1(%arg0: i32, %arg1: memref<6xf32, #tpu.memory_space<smem>>) -> (i32, i32) {
    %c0_i32 = arith.constant 0 : i32
    %c0_i32_0 = arith.constant 0 : i32
    return %arg0, %c0_i32 : i32, i32
  }
}

</mosaic_0001>

<bundles_post_ra>
// kernel: tpu_custom_call.1
= control target key start
LH: loop header
LB: loop body
LE: loop exit
PB: predicated region body
PF: predicated region fallthrough
CT: control target
= control target key end

     0   :  { %s127_s9 = smov [#allocation3]   ;;  %s154_s0 = inlined_call_operand.hbm [shape: f32[6], index: 0, kind: input, shape index: {}]   ;;  %s155_s1 = inlined_call_operand.hbm [shape: f32[2,1024], index: 1, kind: input, shape index: {}]   ;;  %s156_s2 = inlined_call_operand.hbm [shape: f32[2,1024], index: 2, kind: output, shape index: {}]  }
   0x1   :  { %8 = dma.hbm_to_smem %s154_s0, 16, %s127_s9, [#allocation2] }
   0x2   :  { %121 = dma.done.wait [#allocation2], 16 }
   0x3   :  { %122 = vsyncadd [#allocation2], 4294967280 }
   0x4   :  { %10 = sfence }
   0x5   :  { %11 = vsyncpa [#allocation5], 0 }
   0x6   :  { %12 = vsyncpa [#allocation6], 0  ;;  %s128_s12 = smov [#allocation4]  }
   0x7   :  { %s19_s13 = sshll.u32 %s128_s12, 4  ;;  %s20_s13 = int_to_ptr.vmem [resolvable:$true] %s19_s13 }
   0x8   :  { %s89_s14 = scalar_lea.vmem %s20_s13, 256  ;;  %p94_p1 = scmp.lt.s32.totalorder %s20_s13, %s20_s13 }
   0x9   :  { %p90_p0 = scmp.ne.s32.totalorder %s20_s13, %s89_s14  ;;  %p95_p2 = scmp.lt.s32.totalorder %s89_s14, %s89_s14 }
   0xb   :  { %p96_p3 = por %p95_p2, %p94_p1 }
   0xd   :  { %p97_p4 = pnand %p96_p3, %p90_p0 }
   0xf   :  { %100 = shalt.err (!%p97_p4)
}
  0x10   :  { %22 = dma.hbm_to_vmem [thread:$0]  %s155_s1, 256, %s20_s13, [#allocation5]  }
  0x11   :  { %123 = dma.done.wait [#allocation5], 256  }
  0x12   :  { %124 = vsyncadd [#allocation5], 4294967040  ;;  %s26_s0 = sld [smem:[#allocation3]]  ;;  %v30_v0 = vld [vmem:[#allocation4] sm:$0xff]  ;;  %v31_v2 = vld [vmem:[#allocation4 + $0x8] sm:$0xff]  ;;  %s129_s1 = smov [#allocation7]  }
  0x13   :  { %s67_s17 = sld [smem:[#allocation3 + $0x3]]  ;;  %s58_s20 = sshll.u32 %s129_s1, 4  ;;  %s59_s20 = int_to_ptr.vmem [resolvable:$true] %s58_s20 }
  0x14   :  { %s68_s18 = sld [smem:[#allocation3 + $0x4]]  ;;  %s101_s21 = scalar_lea.vmem %s59_s20, 256 }
  0x15   :  { %s69_s19 = sld [smem:[#allocation3 + $0x5]]  ;;  %p102_p5 = scmp.ne.s32.totalorder %s59_s20, %s101_s21 }
  0x16   :  { %p106_p6 = scmp.lt.s32.totalorder %s59_s20, %s59_s20  ;;  %p107_p7 = scmp.lt.s32.totalorder %s101_s21, %s101_s21 }
  0x18   :  { %v32_v1 = vstv %s26_s0  ;;  %p108_p8 = por %p107_p7, %p106_p6 }
  0x19   :  { %v33_v3 = vsub.f32 %v30_v0, %v32_v1  ;;  %v38_v4 = vstv %s67_s17  ;;  %v34_v5 = vsub.f32 %v31_v2, %v32_v1 }
  0x1a   :  { %v35_v6 = vstv %s68_s18  ;;  %v39_v7 = vsub.f32 %v38_v4, %v30_v0  ;;  %v40_v8 = vsub.f32 %v38_v4, %v31_v2  ;;  %p109_p9 = pnand %p108_p8, %p102_p5 }
  0x1b   :  { %v36_v9 = vmul.f32 %v35_v6, %v33_v3  ;;  %v41_v10 = vstv %s69_s19  ;;  %v37_v11 = vmul.f32 %v35_v6, %v34_v5 }
  0x1c   :  { %v42_v12 = vmul.f32 %v41_v10, %v39_v7  ;;  %v43_v13 = vmul.f32 %v41_v10, %v40_v8 }
  0x1e   :  { %v44_v14 = vmin.f32 %v36_v9, %v42_v12  ;;  %v45_v15 = vmin.f32 %v37_v11, %v43_v13 }
  0x20   :  { %v46_v16 = vmin.f32 %v44_v14, 1.0  ;;  %v47_v17 = vmin.f32 %v45_v15, 1.0 }
  0x22   :  { %v48_v18 = vmax.f32 %v46_v16, 0.0  ;;  %v49_v19 = vmax.f32 %v47_v17, 0.0 }
  0x24   :  { %50 = vst [vmem:[#allocation7] sm:$0xff] %v48_v18  ;;  %51 = vst [vmem:[#allocation7 + $0x8] sm:$0xff] %v49_v19 }
  0x25   :  { %112 = shalt.err (!%p109_p9)
}
  0x26   :  { %61 = dma.vmem_to_hbm [thread:$0]  %s59_s20, 256, %s156_s2, [#allocation6]  }
  0x27   :  { %125 = dma.done.wait [#allocation6], 256  }
  0x28   :  { %126 = vsyncadd [#allocation6], 4294967040 }
  0x29   :  { %65 = vsyncpa [#allocation5], 1 }
  0x2a   :  { %66 = vsyncpa [#allocation6], 1 }

</bundles_post_ra>
